<compile_context>
chip_gen: v7x
topology: tpu7x:2x2x1
jax: 0.10.0
libtpu: 0.0.40
codegen_flags: <defaults>
</compile_context>

<pallas_src>
import jax
import jax.numpy as jnp
from jax.experimental import pallas as pl
from jax.experimental.pallas import tpu as pltpu


# ----------------------------------------------------------------------------
# Kernel: one batch tile, everything else resident.
# ----------------------------------------------------------------------------
def _mlp_kernel(x_ref, w1_ref, b1_ref, w2_ref, b2_ref, o_ref):
    # In-kernel bf16 cast of the x tile (f32 in HBM -> bf16 MXU operand).
    x = x_ref[...].astype(jnp.bfloat16)
    # Layer 1: bf16 MXU matmul, f32 accumulation; f32 bias + ReLU epilogue.
    h = jnp.dot(x, w1_ref[...], preferred_element_type=jnp.float32)
    h = jnp.maximum(h + b1_ref[...], 0.0)            # b1 (1, H) broadcasts
    # Layer 2: downcast activations to bf16 for the MXU (inference path),
    # accumulate in f32, f32 bias, lane-dense store.
    out = jnp.dot(h.astype(jnp.bfloat16), w2_ref[...],
                  preferred_element_type=jnp.float32)
    o_ref[...] = (out + b2_ref[...]).astype(o_ref.dtype)


# ----------------------------------------------------------------------------
# Helpers
# ----------------------------------------------------------------------------
def _round_up(n, mult):
    return n + ((-n) % mult)


def _pad_to_shape(a, target_shape):
    pads = [(0, t - s) for s, t in zip(a.shape, target_shape)]
    if all(p == (0, 0) for p in pads):
        return a
    return jnp.pad(a, pads)           # zero padding -> contributes nothing


def _lane_mult(dim):
    # 128-lane floor everywhere; 256 when the logical dim already spans a full
    # 256-wide MXU pass (v6e/v7x 2x256^2 arrays).  128 is optimal on v5e.
    return 256 if dim >= 256 else 128


def _resident_spec(shape):
    """BlockSpec for a grid-invariant operand: constant index_map, single
    buffer (double-buffering a block that never changes wastes VMEM)."""
    try:
        return pl.BlockSpec(shape, lambda i: (0, 0),
                            pipeline_mode=pl.Buffered(1))
    except (TypeError, AttributeError):
        # Older jax without pipeline_mode: fall back to the default.
        return pl.BlockSpec(shape, lambda i: (0, 0))


def _physical_vmem_bytes():
    try:
        return int(pltpu.get_tpu_info().vmem_capacity_bytes)
    except Exception:
        return 64 * 1024 * 1024       # conservative: v7x per-TC VMEM


# ----------------------------------------------------------------------------
# Wrapper
# ----------------------------------------------------------------------------
def base_nn_forward(x, w1, b1, w2, b2, *, batch_tile=512,
                    out_dtype=jnp.float32):
    """Fused 2-layer MLP forward pass as a single Pallas TPU kernel."""
    batch, in_features = x.shape
    hidden = w1.shape[1]
    num_classes = w2.shape[1]

    # ---- feature-dim padding: K only needs sublane (8) alignment for the
    #      contraction; H/C are padded lane-dense so both matmuls fill the MXU
    #      and the output store is an unmasked, lane-dense vst.
    K = _round_up(in_features, 8)
    H = _round_up(hidden, _lane_mult(hidden))
    C = _round_up(num_classes, _lane_mult(num_classes))

    # ---- reused operands: pad + cast ONCE in the wrapper.
    w1_p = _pad_to_shape(w1, (K, H)).astype(jnp.bfloat16)
    b1_p = _pad_to_shape(b1, (1, H)).astype(jnp.float32)
    w2_p = _pad_to_shape(w2, (H, C)).astype(jnp.bfloat16)
    b2_p = _pad_to_shape(b2, (1, C)).astype(jnp.float32)

    # ---- x stays f32 (cast happens in-kernel); pad K only if needed.
    x_p = _pad_to_shape(x.astype(jnp.float32), (batch, K))

    # ---- batch tiling: multiple-of-16 tiles (bf16 sublane packing), padding
    #      bounded by one tile, and >=2 grid steps whenever batch >= 32 so the
    #      "parallel" axis shards across v7x's 2 TensorCores.
    b16 = _round_up(batch, 16)
    if b16 >= 32:
        tile_b = min(batch_tile, _round_up((b16 + 1) // 2, 16))
    else:
        tile_b = b16
    padded_batch = _round_up(b16, tile_b)
    x_p = _pad_to_shape(x_p, (padded_batch, K))
    grid = (padded_batch // tile_b,)

    # ---- generation/shape-aware VMEM budget.
    x_bytes = 2 * tile_b * K * 4           # double-buffered f32 x tile
    out_bytes = 2 * tile_b * C * 4         # double-buffered f32 out tile
    w_bytes = (K * H + H * C) * 2          # single-buffered bf16 weights
    bias_bytes = (H + C) * 4               # single-buffered f32 biases
    act_bytes = tile_b * (H + C) * 4       # f32 h + pre-store intermediate
    footprint = x_bytes + out_bytes + w_bytes + bias_bytes + act_bytes
    vmem_cap = int(_physical_vmem_bytes() * 0.75)   # ~48 MiB v7x, ~96 MiB v5e/v6e
    vmem_limit = int(min(vmem_cap, max(32 * 1024 * 1024, 2 * footprint)))

    out_padded = pl.pallas_call(
        _mlp_kernel,
        out_shape=jax.ShapeDtypeStruct((padded_batch, C), out_dtype),
        grid=grid,
        in_specs=[
            pl.BlockSpec((tile_b, K), lambda i: (i, 0)),   # x streams over batch
            _resident_spec((K, H)),                        # W1 resident
            _resident_spec((1, H)),                        # b1 resident
            _resident_spec((H, C)),                        # W2 resident
            _resident_spec((1, C)),                        # b2 resident
        ],
        out_specs=pl.BlockSpec((tile_b, C), lambda i: (i, 0)),
        compiler_params=pltpu.CompilerParams(
            dimension_semantics=("parallel",),
            vmem_limit_bytes=vmem_limit,
        ),
    )(x_p, w1_p, b1_p, w2_p, b2_p)

    # Slice the lane-dense padded slab back to the logical output.
    return out_padded[:batch, :num_classes]


def jax_reference(x, w1, b1, w2, b2):
    h = jnp.maximum(x @ w1 + b1, 0.0)
    return h @ w2 + b2


if __name__ == "__main__":
    # _build_self(): deterministic parameter construction at small shapes.
    batch, in_features, hidden, num_classes = 8, 32, 64, 16
    key = jax.random.PRNGKey(0)
    kx, k1, k2, k3, k4 = jax.random.split(key, 5)

    x = jax.random.normal(kx, (batch, in_features), dtype=jnp.float32)
    w1 = jax.random.normal(k1, (in_features, hidden), dtype=jnp.float32) * 0.1
    b1 = jax.random.normal(k2, (1, hidden), dtype=jnp.float32) * 0.1
    w2 = jax.random.normal(k3, (hidden, num_classes), dtype=jnp.float32) * 0.1
    b2 = jax.random.normal(k4, (1, num_classes), dtype=jnp.float32) * 0.1

    out = base_nn_forward(x, w1, b1, w2, b2)
    jax.block_until_ready(out)

    ref = jax_reference(x, w1, b1, w2, b2)
    assert out.shape == (batch, num_classes)
    # bf16 MXU operands with f32 accumulation -> bf16-appropriate tolerance.
    err = float(jnp.max(jnp.abs(out - ref)))
    assert jnp.allclose(out, ref, atol=5e-2, rtol=5e-2), err

    # TODO(synk): BaseNN.forward is @abstractmethod — no concrete semantics
    # exist in the base class; this kernel implements the standard FFN head
    # used by its concrete subclasses.
    print("KERNEL_OK")
</pallas_src>

<mosaic_0001>
module attributes {stable_mosaic.version = 11 : i64} {
  func.func @_mlp_kernel(%arg0: i32, %arg1: memref<16x32xf32, #tpu.memory_space<vmem>>, %arg2: memref<32x128xbf16, #tpu.memory_space<vmem>>, %arg3: memref<1x128xf32, #tpu.memory_space<vmem>>, %arg4: memref<128x128xbf16, #tpu.memory_space<vmem>>, %arg5: memref<1x128xf32, #tpu.memory_space<vmem>>, %arg6: memref<16x128xf32, #tpu.memory_space<vmem>>) attributes {dimension_semantics = [#tpu.dimension_semantics<parallel>], iteration_bounds = array<i64: 1>, scalar_prefetch = 0 : i64, scratch_operands = 0 : i64, tpu.core_type = #tpu.core_type<tc>, window_params = [{transform_indices = @transform_0, window_bounds = array<i64: 16, 32>}, {pipeline_mode = #tpu.pipeline_mode<synchronous>, transform_indices = @transform_1, window_bounds = array<i64: 32, 128>}, {pipeline_mode = #tpu.pipeline_mode<synchronous>, transform_indices = @transform_2, window_bounds = array<i64: 1, 128>}, {pipeline_mode = #tpu.pipeline_mode<synchronous>, transform_indices = @transform_3, window_bounds = array<i64: 128, 128>}, {pipeline_mode = #tpu.pipeline_mode<synchronous>, transform_indices = @transform_4, window_bounds = array<i64: 1, 128>}, {transform_indices = @transform_5, window_bounds = array<i64: 16, 128>}]} {
    %c0 = arith.constant 0 : index
    %c0_0 = arith.constant 0 : index
    %0 = vector.load %arg1[%c0, %c0_0] : memref<16x32xf32, #tpu.memory_space<vmem>>, vector<16x32xf32>
    %1 = arith.truncf %0 : vector<16x32xf32> to vector<16x32xbf16>
    %c0_1 = arith.constant 0 : index
    %c0_2 = arith.constant 0 : index
    %2 = vector.load %arg2[%c0_1, %c0_2] : memref<32x128xbf16, #tpu.memory_space<vmem>>, vector<32x128xbf16>
    %cst = arith.constant dense<0.000000e+00> : vector<16x128xf32>
    %3 = tpu.matmul %1, %2, %cst {dimension_numbers = #tpu.dot_dimension_numbers<[1], [0], [0], [1], [0, 0, 1, 1], [], []>} : vector<16x32xbf16>, vector<32x128xbf16>, vector<16x128xf32> -> vector<16x128xf32>
    %c0_3 = arith.constant 0 : index
    %c0_4 = arith.constant 0 : index
    %4 = vector.load %arg3[%c0_3, %c0_4] : memref<1x128xf32, #tpu.memory_space<vmem>>, vector<1x128xf32>
    %5 = vector.broadcast %4 : vector<1x128xf32> to vector<16x128xf32>
    %6 = arith.addf %3, %5 : vector<16x128xf32>
    %cst_5 = arith.constant 0.000000e+00 : f32
    %7 = vector.broadcast %cst_5 : f32 to vector<16x128xf32>
    %8 = arith.maximumf %6, %7 : vector<16x128xf32>
    %9 = arith.truncf %8 : vector<16x128xf32> to vector<16x128xbf16>
    %c0_6 = arith.constant 0 : index
    %c0_7 = arith.constant 0 : index
    %10 = vector.load %arg4[%c0_6, %c0_7] : memref<128x128xbf16, #tpu.memory_space<vmem>>, vector<128x128xbf16>
    %cst_8 = arith.constant dense<0.000000e+00> : vector<16x128xf32>
    %11 = tpu.matmul %9, %10, %cst_8 {dimension_numbers = #tpu.dot_dimension_numbers<[1], [0], [0], [1], [0, 0, 1, 1], [], []>} : vector<16x128xbf16>, vector<128x128xbf16>, vector<16x128xf32> -> vector<16x128xf32>
    %c0_9 = arith.constant 0 : index
    %c0_10 = arith.constant 0 : index
    %12 = vector.load %arg5[%c0_9, %c0_10] : memref<1x128xf32, #tpu.memory_space<vmem>>, vector<1x128xf32>
    %13 = vector.broadcast %12 : vector<1x128xf32> to vector<16x128xf32>
    %14 = arith.addf %11, %13 : vector<16x128xf32>
    %c0_11 = arith.constant 0 : index
    %c0_12 = arith.constant 0 : index
    %15 = vector.load %arg6[%c0_11, %c0_12] : memref<16x128xf32, #tpu.memory_space<vmem>>, vector<16x128xf32>
    tpu.vector_store %arg6[%c0_11, %c0_12], %14 {strides = array<i32>} : memref<16x128xf32, #tpu.memory_space<vmem>>, vector<16x128xf32>,
    return
  }
  func.func @transform_0(%arg0: i32) -> (i32, i32) {
    %c0_i32 = arith.constant 0 : i32
    %c0_i32_0 = arith.constant 0 : i32
    return %arg0, %c0_i32 : i32, i32
  }
  func.func @transform_1(%arg0: i32) -> (i32, i32) {
    %c0_i32 = arith.constant 0 : i32
    %c0_i32_0 = arith.constant 0 : i32
    %c0_i32_1 = arith.constant 0 : i32
    return %c0_i32, %c0_i32_0 : i32, i32
  }
  func.func @transform_2(%arg0: i32) -> (i32, i32) {
    %c0_i32 = arith.constant 0 : i32
    %c0_i32_0 = arith.constant 0 : i32
    %c0_i32_1 = arith.constant 0 : i32
    return %c0_i32, %c0_i32_0 : i32, i32
  }
  func.func @transform_3(%arg0: i32) -> (i32, i32) {
    %c0_i32 = arith.constant 0 : i32
    %c0_i32_0 = arith.constant 0 : i32
    %c0_i32_1 = arith.constant 0 : i32
    return %c0_i32, %c0_i32_0 : i32, i32
  }
  func.func @transform_4(%arg0: i32) -> (i32, i32) {
    %c0_i32 = arith.constant 0 : i32
    %c0_i32_0 = arith.constant 0 : i32
    %c0_i32_1 = arith.constant 0 : i32
    return %c0_i32, %c0_i32_0 : i32, i32
  }
  func.func @transform_5(%arg0: i32) -> (i32, i32) {
    %c0_i32 = arith.constant 0 : i32
    %c0_i32_0 = arith.constant 0 : i32
    return %arg0, %c0_i32 : i32, i32
  }
}

</mosaic_0001>

<bundles_post_ra>
// kernel: tpu_custom_call.1
= control target key start
LH: loop header
LB: loop body
LE: loop exit
PB: predicated region body
PF: predicated region fallthrough
CT: control target
= control target key end

     0   :  { %10 = vsyncpa [#allocation3], 0  ;;  %s542_s0 = inlined_call_operand.hbm [shape: f32[16,32], index: 0, kind: input, shape index: {}]   ;;  %s543_s1 = inlined_call_operand.hbm [shape: bf16[32,128], index: 1, kind: input, shape index: {}]   ;;  %s544_s2 = inlined_call_operand.vmem [shape: f32[1,128], index: 2, kind: input, shape index: {}]   ;;  %s545_s3 = inlined_call_operand.hbm [shape: bf16[128,128], index: 3, kind: input, shape index: {}]   ;;  %s546_s4 = inlined_call_operand.vmem [shape: f32[1,128], index: 4, kind: input, shape index: {}]   ;;  %s547_s5 = inlined_call_operand.hbm [shape: f32[16,128], index: 5, kind: output, shape index: {}]  }
   0x1   :  { %11 = vsyncpa [#allocation6], 0 }
   0x2   :  { %12 = vsyncpa [#allocation4], 0  ;;  %s436_s18 = smov [#allocation5]   ;;  %s342_s22 = scalar_lea.hbm %s543_s1, 256 }
   0x3   :  { %s30_s19 = sshll.u32 %s436_s18, 4  ;;  %p343_p0 = scmp.ne.s32.totalorder %s543_s1, %s342_s22  ;;  %s31_s19 = int_to_ptr.vmem [resolvable:$true] %s30_s19 }
   0x4   :  { %p346_p1 = scmp.lt.u32.totalorder %s342_s22, %s543_s1 }
   0x6   :  { %p348_p2 = pnand %p346_p1, %p343_p0 }
   0x8   :  { %351 = shalt.err (!%p348_p2)
}
   0x9   :  { %s352_s27 = scalar_lea.vmem %s31_s19, 256  ;;  %p357_p4 = scmp.lt.s32.totalorder %s31_s19, %s31_s19 }
   0xa   :  { %p353_p3 = scmp.ne.s32.totalorder %s31_s19, %s352_s27  ;;  %p358_p5 = scmp.lt.s32.totalorder %s352_s27, %s352_s27 }
   0xc   :  { %p359_p6 = por %p358_p5, %p357_p4 }
   0xe   :  { %p360_p7 = pnand %p359_p6, %p353_p3 }
  0x10   :  { %363 = shalt.err (!%p360_p7)
}
  0x11   :  { %s437_s28 = smov 64   ;;  %s438_s29 = smov 4  }
  0x12   :  { %36 = dma.hbm_to_vmem [thread:$0]  %s543_s1, 256, %s31_s19, [#allocation6], %s437_s28, %s437_s28, %s438_s29  }
  0x13   :  { %s439_s7 = smov [#allocation2]   ;;  %s364_s11 = scalar_lea.hbm %s542_s0, 256 }
  0x14   :  { %s18_s8 = sshll.u32 %s439_s7, 4  ;;  %p365_p8 = scmp.ne.s32.totalorder %s542_s0, %s364_s11  ;;  %s19_s8 = int_to_ptr.vmem [resolvable:$true] %s18_s8 }
  0x15   :  { %p368_p9 = scmp.lt.u32.totalorder %s364_s11, %s542_s0 }
  0x17   :  { %p370_p10 = pnand %p368_p9, %p365_p8 }
  0x19   :  { %373 = shalt.err (!%p370_p10)
}
  0x1a   :  { %s374_s16 = scalar_lea.vmem %s19_s8, 256  ;;  %p379_p12 = scmp.lt.s32.totalorder %s19_s8, %s19_s8 }
  0x1b   :  { %p375_p11 = scmp.ne.s32.totalorder %s19_s8, %s374_s16  ;;  %p380_p13 = scmp.lt.s32.totalorder %s374_s16, %s374_s16 }
  0x1d   :  { %p381_p0 = por %p380_p13, %p379_p12 }
  0x1f   :  { %p382_p1 = pnand %p381_p0, %p375_p11 }
  0x21   :  { %385 = shalt.err (!%p382_p1)
}
  0x22   :  { %s440_s1 = smov 128   ;;  %s441_s17 = smov 8  }
  0x23   :  { %24 = dma.hbm_to_vmem [thread:$0]  %s542_s0, 256, %s19_s8, [#allocation3], %s440_s1, %s440_s1, %s441_s17  }
  0x24   :  { %s442_s20 = smov [#allocation7]   ;;  %s386_s24 = scalar_lea.hbm %s545_s3, 1024 }
  0x25   :  { %s44_s21 = sshll.u32 %s442_s20, 4  ;;  %p387_p2 = scmp.ne.s32.totalorder %s545_s3, %s386_s24  ;;  %s45_s21 = int_to_ptr.vmem [resolvable:$true] %s44_s21 }
  0x26   :  { %p390_p3 = scmp.lt.u32.totalorder %s386_s24, %s545_s3 }
  0x28   :  { %p392_p4 = pnand %p390_p3, %p387_p2 }
  0x2a   :  { %395 = shalt.err (!%p392_p4)
}
  0x2b   :  { %s396_s6 = scalar_lea.vmem %s45_s21, 1024  ;;  %p401_p6 = scmp.lt.s32.totalorder %s45_s21, %s45_s21 }
  0x2c   :  { %p397_p5 = scmp.ne.s32.totalorder %s45_s21, %s396_s6  ;;  %p402_p7 = scmp.lt.s32.totalorder %s396_s6, %s396_s6 }
  0x2e   :  { %p403_p8 = por %p402_p7, %p401_p6 }
  0x30   :  { %p404_p9 = pnand %p403_p8, %p397_p5 }
  0x32   :  { %407 = shalt.err (!%p404_p9)
}
  0x33   :  { %50 = dma.hbm_to_vmem [thread:$0]  %s545_s3, 1024, %s45_s21, [#allocation6], %s437_s28, %s437_s28, %s438_s29  }
  0x34   :  { %430 = dma.done.wait [#allocation3], 256  }
  0x35   :  { %431 = vsyncadd [#allocation3], 4294967040 }
  0x36   :  { %432 = dma.done.wait [#allocation6], 1280  }
  0x37   :  { %433 = vsyncadd [#allocation6], 4294966016  ;;  %v443_v0 = vmov 0.0   ;;  %vm444_vm0 = vmmov 0   ;;  %v332_v1 = vld [vmem:[#allocation5] sm:$0xff]   ;;  %v333_v2 = vld [vmem:[#allocation5 + $0x8] sm:$0xff]  }
  0x38   :  { %294 = vmatprep.subr.bf16.mxu0 %v443_v0  ;;  %298 = vmatprep.mubr.msk.bf16.mxu0 %vm444_vm0, %v443_v0  ;;  %v63_v3 = vld [vmem:[#allocation2] sm:$0xff]  ;;  %v64_v4 = vld [vmem:[#allocation2 + $0x8] sm:$0xff]  ;;  %vm89_vm1 = vcmask 261120   ;;  %v336_v8 = vld [vmem:[#allocation7 + $0x10] sm:$0xff]   ;;  %s445_s9 = smov [#allocation8]  }
  0x39   :  { %302 = vmatprep.subr.bf16.mxu1 %v443_v0  ;;  %318 = vmatprep.mubr.msk.bf16.mxu1 %vm444_vm0, %v443_v0  ;;  %v334_v5 = vld [vmem:[#allocation7] sm:$0xff]   ;;  %v65_v6 = vpack.c.bf16 %v64_v4, %v63_v3  ;;  %v335_v7 = vld [vmem:[#allocation7 + $0x8] sm:$0xff]   ;;  %v337_v9 = vld [vmem:[#allocation7 + $0x18] sm:$0xff]   ;;  %s256_s10 = sshll.u32 %s445_s9, 4  ;;  %s257_s10 = int_to_ptr.vmem [resolvable:$true] %s256_s10 }
  0x3a   :  { %295 = vmatpush3.bf16.msra.mxu0 %v332_v1  ;;  %303 = vmatpush3.bf16.msra.mxu1 %v334_v5  ;;  %v338_v10 = vld [vmem:[#allocation7 + $0x20] sm:$0xff]   ;;  %v339_v11 = vld [vmem:[#allocation7 + $0x28] sm:$0xff]   ;;  %v340_v12 = vld [vmem:[#allocation7 + $0x30] sm:$0xff]   ;;  %p413_p11 = scmp.lt.s32.totalorder %s257_s10, %s257_s10 }
  0x3b   :  { %296 = vmatprep.subr.bf16.mxu0 %v443_v0  ;;  %304 = vmatprep.subr.bf16.mxu1 %v443_v0  ;;  %v341_v13 = vld [vmem:[#allocation7 + $0x38] sm:$0xff]   ;;  %v269_v14 = vld [vmem:[%s544_s2] ss:$0 sm:$0xff]  ;;  %s408_s2 = scalar_lea.vmem %s257_s10, 256 }
  0x3c   :  { %v273_v24 = vld [vmem:[%s546_s4] ss:$0 sm:$0xff]  ;;  %p409_p10 = scmp.ne.s32.totalorder %s257_s10, %s408_s2  ;;  %p414_p12 = scmp.lt.s32.totalorder %s408_s2, %s408_s2 }
  0x3e   :  { %297 = vmatpush3.bf16.msra.mxu0 %v333_v2  ;;  %305 = vmatpush3.bf16.msra.mxu1 %v335_v7  ;;  %p415_p13 = por %p414_p12, %p413_p11 }
  0x3f   :  { %306 = vmatprep.subr.bf16.mxu1 %v443_v0 }
  0x40   :  { %p416_p0 = pnand %p415_p13, %p409_p10 }
  0x41   :  { %299 = vmatmul.mubr.msk.bf16.vlgmr.msra.gmra.mrb[0].mxu0 %vm89_vm1, %v65_v6 }
  0x42   :  { %307 = vmatpush3.bf16.msra.mxu1 %v336_v8 }
  0x43   :  { %308 = vmatprep.subr.bf16.mxu1 %v443_v0 }
  0x46   :  { %309 = vmatpush3.bf16.msra.mxu1 %v337_v9 }
  0x47   :  { %310 = vmatprep.subr.bf16.mxu1 %v443_v0 }
  0x4a   :  { %311 = vmatpush3.bf16.msra.mxu1 %v338_v10 }
  0x4b   :  { %312 = vmatprep.subr.bf16.mxu1 %v443_v0 }
  0x4e   :  { %313 = vmatpush3.bf16.msra.mxu1 %v339_v11 }
  0x4f   :  { %314 = vmatprep.subr.bf16.mxu1 %v443_v0 }
  0x52   :  { %315 = vmatpush3.bf16.msra.mxu1 %v340_v12 }
  0x53   :  { %316 = vmatprep.subr.bf16.mxu1 %v443_v0 }
  0x56   :  { %317 = vmatpush3.bf16.msra.mxu1 %v341_v13 }
 0x114   :  { %v127_v15 = vpop.f32.mrb[0].mxu0 }
 0x115   :  { %v128_v16 = vadd.f32 %v269_v14, %v127_v15  ;;  %v300_v17 = vpop.f32.mrb[1].mxu0 }
 0x116   :  { %v130_v18 = vpop.f32.mrb[2].mxu0 }
 0x117   :  { %v131_v19 = vadd.f32 %v269_v14, %v130_v18  ;;  %v301_v20 = vpop.f32.mrb[3].mxu0  ;;  %v134_v21 = vmax.f32 %v128_v16, 0.0 }
 0x119   :  { %v135_v22 = vmax.f32 %v131_v19, 0.0 }
 0x11b   :  { %v136_v23 = vpack.c.bf16 %v135_v22, %v134_v21 }
 0x11d   :  { %319 = vmatmul.mubr.bf16.vlgmr.msra.gmra.mrb[0].mxu1 %v136_v23 }
 0x1f0   :  { %v242_v25 = vpop.f32.mrb[0].mxu1 }
 0x1f1   :  { %v243_v26 = vadd.f32 %v273_v24, %v242_v25  ;;  %v320_v27 = vpop.f32.mrb[1].mxu1 }
 0x1f2   :  { %v245_v28 = vpop.f32.mrb[2].mxu1 }
 0x1f3   :  { %249 = vst [vmem:[#allocation8] sm:$0xff] %v243_v26  ;;  %v246_v29 = vadd.f32 %v273_v24, %v245_v28  ;;  %v321_v30 = vpop.f32.mrb[3].mxu1 }
 0x1f5   :  { %250 = vst [vmem:[#allocation8 + $0x8] sm:$0xff] %v246_v29 }
 0x1f6   :  { %419 = shalt.err (!%p416_p0)
}
 0x1f7   :  { %s420_s12 = scalar_lea.hbm %s547_s5, 256 }
 0x1f8   :  { %p421_p1 = scmp.ne.s32.totalorder %s547_s5, %s420_s12  ;;  %p424_p2 = scmp.lt.u32.totalorder %s420_s12, %s547_s5 }
 0x1fa   :  { %p426_p3 = pnand %p424_p2, %p421_p1 }
 0x1fc   :  { %429 = shalt.err (!%p426_p3)
}
 0x1fd   :  { %262 = dma.vmem_to_hbm [thread:$0]  %s257_s10, 256, %s547_s5, [#allocation4], %s440_s1, %s440_s1, %s441_s17  }
 0x1fe   :  { %434 = dma.done.wait [#allocation4], 256  }
 0x1ff   :  { %435 = vsyncadd [#allocation4], 4294967040 }
 0x200   :  { %266 = vsyncpa [#allocation3], 1 }
 0x201   :  { %267 = vsyncpa [#allocation6], 1 }
 0x202   :  { %268 = vsyncpa [#allocation4], 1 }

</bundles_post_ra>
